<compile_context>
chip_gen: v6e
topology: v6e:2x2x1
jax: 0.10.0
libtpu: 0.0.40
codegen_flags: <defaults>
</compile_context>

<pallas_src>
import math

import jax
import jax.numpy as jnp
import numpy as np
from jax.experimental import pallas as pl
from jax.experimental.pallas import tpu as pltpu


# ---------------------------------------------------------------------------
# Filter construction (host side; the module stores no learned parameters).
# ---------------------------------------------------------------------------
def _create_kernel_1d(width, cutoff=0.25):
    # TODO(synk): `create_kernel` is not defined in the provided source file;
    # this is a deterministic Hann-windowed-sinc low-pass (ratio=2 -> cutoff
    # 0.25 of the sample rate) with half-width = width // 4, normalized to
    # unit DC gain.  The module's 2D filter is the separable outer product.
    half_width = max(1, width // 4)
    n = np.arange(-half_width, half_width + 1, dtype=np.float64)
    sinc = 2.0 * cutoff * np.sinc(2.0 * cutoff * n)
    window = 0.5 * (1.0 + np.cos(np.pi * n / (half_width + 1)))
    k1d = sinc * window
    return k1d / k1d.sum()          # (K,), K = 2*half_width + 1 (odd)


def _band_matrix(k1d, n, half):
    # B[q, c] = k1d[q - c + half] inside the band, 0 outside.  (X @ B) applies
    # the zero-padded K-tap correlation along X's trailing length-n axis, so
    # the module's F.pad boundary condition is folded into the matrix and the
    # odd-K crop [..., :H, :W] is a no-op by construction.
    K = len(k1d)
    idx = np.arange(n)
    off = idx[:, None] - idx[None, :] + half
    band = np.zeros((n, n), dtype=np.float64)
    valid = (off >= 0) & (off < K)
    band[valid] = k1d[off[valid]]
    return band


def _round_up(a, b):
    return -(-a // b) * b


def _choose_batch_rows(N, sub=8, target=256):
    """Images (sublane rows) per grid step for the flat fast path."""
    n_sub = _round_up(max(N, 1), sub)
    bs = min(_round_up(target, sub), n_sub)
    # v7x has two TensorCores: keep >= 2 grid steps whenever the batch allows.
    if n_sub >= 2 * sub:
        half_rows = max(((n_sub // 2) // sub) * sub, sub)
        bs = min(bs, half_rows)
    return max(bs, sub)


# ---------------------------------------------------------------------------
# Kernels
# ---------------------------------------------------------------------------
def _flat_sinc_kernel(m_ref, x_ref, o_ref):
    # x_ref: (bs, H*W) caller dtype; m_ref: (H*W, H*W) bf16 combined operator.
    x = x_ref[...].astype(jnp.bfloat16)               # bf16 MXU operands
    o_ref[...] = jnp.dot(
        x, m_ref[...], preferred_element_type=jnp.float32
    ).astype(o_ref.dtype)


def _sep_sinc_kernel(ah_ref, aw_ref, x_ref, o_ref):
    # One image per grid step:  out = (B_h^T) @ X @ B_w  (bf16 ops, f32 acc).
    x = x_ref[0].astype(jnp.bfloat16)                  # (H, W)
    y = jnp.dot(ah_ref[...], x, preferred_element_type=jnp.float32)
    o_ref[0] = jnp.dot(
        y.astype(jnp.bfloat16), aw_ref[...], preferred_element_type=jnp.float32
    ).astype(o_ref.dtype)


# ---------------------------------------------------------------------------
# Wrapper
# ---------------------------------------------------------------------------
_FLAT_PATH_MAX_PIXELS = 1024   # (H*W)^2 bf16 operator <= 2 MiB


def lowpass_windowed_sinc(x, pad=True):
    if not pad:
        # TODO(synk): the module's pad=False path fails its own final reshape
        # (the valid conv shrinks H/W); only the default pad=True is supported.
        raise NotImplementedError("pad=False is not supported (broken in source)")

    shape = x.shape
    H, W = int(shape[-2]), int(shape[-1])
    N = math.prod(shape[:-2]) if len(shape) > 2 else 1

    k1d = _create_kernel_1d(W)
    half = len(k1d) // 2
    out_dtype = x.dtype
    x_isize = jnp.dtype(x.dtype).itemsize
    out_isize = jnp.dtype(out_dtype).itemsize

    b_h = _band_matrix(k1d, H, half)   # (H, H)
    b_w = _band_matrix(k1d, W, half)   # (W, W)

    if H * W <= _FLAT_PATH_MAX_PIXELS:
        # -------- small-image fast path: one full-occupancy matmul ----------
        HW = H * W
        # out_flat[n, i*W+j] = sum_{p,q} B_h[p,i] B_w[q,j] x_flat[n, p*W+q]
        m = jnp.asarray(np.kron(b_h, b_w), jnp.bfloat16)        # (HW, HW)
        x_flat = jnp.reshape(x, (N, HW))                        # free reshape
        bs = _choose_batch_rows(N)
        n_pad = _round_up(N, bs)
        if n_pad != N:
            x_flat = jnp.pad(x_flat, ((0, n_pad - N), (0, 0)))

        vmem = (2 * HW * HW * 2                 # operator (double-buffered, bf16)
                + 2 * bs * HW * x_isize         # input block x2
                + 2 * bs * HW * out_isize       # output block x2
                + bs * HW * 4)                  # f32 accumulation intermediate
        vmem_limit = int(min(max(vmem + (4 << 20), 16 << 20), 48 << 20))

        out_flat = pl.pallas_call(
            _flat_sinc_kernel,
            out_shape=jax.ShapeDtypeStruct((n_pad, HW), out_dtype),
            grid=(n_pad // bs,),
            in_specs=[
                pl.BlockSpec((HW, HW), lambda n: (0, 0)),       # operator
                pl.BlockSpec((bs, HW), lambda n: (n, 0)),       # images
            ],
            out_specs=pl.BlockSpec((bs, HW), lambda n: (n, 0)),
            compiler_params=pltpu.CompilerParams(
                dimension_semantics=("parallel",),
                vmem_limit_bytes=vmem_limit),
        )(m, x_flat)
        return out_flat[:N].reshape(shape)

    # -------- general path: per-image separable two-matmul pass -------------
    ah = jnp.asarray(b_h.T, jnp.bfloat16)   # left-multiply (H pass)
    aw = jnp.asarray(b_w, jnp.bfloat16)     # right-multiply (W pass)
    xr = jnp.reshape(x, (N, H, W))          # free reshape, no transposes

    vmem = (2 * H * H * 2 + 2 * W * W * 2
            + 2 * H * W * x_isize
            + 2 * H * W * out_isize
            + 2 * H * W * 4)
    vmem_limit = int(min(max(vmem + (4 << 20), 16 << 20), 48 << 20))

    out = pl.pallas_call(
        _sep_sinc_kernel,
        out_shape=jax.ShapeDtypeStruct((N, H, W), out_dtype),
        grid=(N,),
        in_specs=[
            pl.BlockSpec((H, H), lambda n: (0, 0)),
            pl.BlockSpec((W, W), lambda n: (0, 0)),
            pl.BlockSpec((1, H, W), lambda n: (n, 0, 0)),
        ],
        out_specs=pl.BlockSpec((1, H, W), lambda n: (n, 0, 0)),
        compiler_params=pltpu.CompilerParams(
            dimension_semantics=("parallel",),
            vmem_limit_bytes=vmem_limit),
    )(ah, aw, xr)
    # TODO(synk): sublane-pack several mid-sized images per grid step to
    # amortize the ~0.35us/step overhead when H, W are well below an MXU tile.
    return out.reshape(shape)


# ---------------------------------------------------------------------------
# Exact float64 NumPy reference (zero-pad + 'valid' 2D correlation + crop).
# ---------------------------------------------------------------------------
def _reference_np(x_np):
    shape = x_np.shape
    H, W = shape[-2], shape[-1]
    k1d = _create_kernel_1d(W)
    K = len(k1d)
    half = K // 2
    k2d = np.outer(k1d, k1d)
    xr = x_np.reshape(-1, H, W).astype(np.float64)
    xp = np.pad(xr, ((0, 0), (half, half), (half, half)))
    out = np.zeros_like(xr)
    for i in range(K):
        for j in range(K):
            out += k2d[i, j] * xp[:, i:i + H, j:j + W]
    return out[:, :H, :W].reshape(shape)


if __name__ == "__main__":
    key = jax.random.PRNGKey(0)
    k1, k2 = jax.random.split(key)

    # Tolerance budget: bf16 MXU operands (x and the filter matrices are
    # rounded to bf16; accumulation stays f32).  For a unit-DC smoothing
    # filter this gives absolute errors ~1e-3..1e-2; structural/layout errors
    # would be O(1), so 3e-2 still discriminates sharply.
    rtol, atol = 2e-2, 3e-2

    # Small-image fast path (flattened kron operator): (batch, channels, H, W).
    x_small = jax.random.normal(k1, (2, 4, 16, 16), dtype=jnp.float32)
    y_small = jax.block_until_ready(lowpass_windowed_sinc(x_small))
    assert y_small.shape == x_small.shape
    np.testing.assert_allclose(
        np.asarray(y_small), _reference_np(np.asarray(x_small)),
        rtol=rtol, atol=atol)

    # General per-image separable path (H*W above the fast-path threshold).
    x_big = jax.random.normal(k2, (1, 2, 40, 40), dtype=jnp.float32)
    y_big = jax.block_until_ready(lowpass_windowed_sinc(x_big))
    assert y_big.shape == x_big.shape
    np.testing.assert_allclose(
        np.asarray(y_big), _reference_np(np.asarray(x_big)),
        rtol=rtol, atol=atol)

    print("KERNEL_OK")
</pallas_src>

<mosaic_0001>
module attributes {stable_mosaic.version = 11 : i64} {
  func.func @_flat_sinc_kernel(%arg0: i32, %arg1: memref<256x256xbf16, #tpu.memory_space<vmem>>, %arg2: memref<8x256xf32, #tpu.memory_space<vmem>>, %arg3: memref<8x256xf32, #tpu.memory_space<vmem>>) attributes {dimension_semantics = [#tpu.dimension_semantics<parallel>], iteration_bounds = array<i64: 1>, scalar_prefetch = 0 : i64, scratch_operands = 0 : i64, tpu.core_type = #tpu.core_type<tc>, window_params = [{pipeline_mode = #tpu.pipeline_mode<synchronous>, transform_indices = @transform_0, window_bounds = array<i64: 256, 256>}, {transform_indices = @transform_1, window_bounds = array<i64: 8, 256>}, {transform_indices = @transform_2, window_bounds = array<i64: 8, 256>}]} {
    %c0 = arith.constant 0 : index
    %c0_0 = arith.constant 0 : index
    %0 = vector.load %arg2[%c0, %c0_0] : memref<8x256xf32, #tpu.memory_space<vmem>>, vector<8x256xf32>
    %1 = arith.truncf %0 : vector<8x256xf32> to vector<8x256xbf16>
    %c0_1 = arith.constant 0 : index
    %c0_2 = arith.constant 0 : index
    %2 = vector.load %arg1[%c0_1, %c0_2] : memref<256x256xbf16, #tpu.memory_space<vmem>>, vector<256x256xbf16>
    %cst = arith.constant dense<0.000000e+00> : vector<8x256xf32>
    %3 = tpu.matmul %1, %2, %cst {dimension_numbers = #tpu.dot_dimension_numbers<[1], [0], [0], [1], [0, 0, 1, 1], [], []>} : vector<8x256xbf16>, vector<256x256xbf16>, vector<8x256xf32> -> vector<8x256xf32>
    %c0_3 = arith.constant 0 : index
    %c0_4 = arith.constant 0 : index
    %4 = vector.load %arg3[%c0_3, %c0_4] : memref<8x256xf32, #tpu.memory_space<vmem>>, vector<8x256xf32>
    tpu.vector_store %arg3[%c0_3, %c0_4], %3 {strides = array<i32>} : memref<8x256xf32, #tpu.memory_space<vmem>>, vector<8x256xf32>,
    return
  }
  func.func @transform_0(%arg0: i32) -> (i32, i32) {
    %c0_i32 = arith.constant 0 : i32
    %c0_i32_0 = arith.constant 0 : i32
    %c0_i32_1 = arith.constant 0 : i32
    return %c0_i32, %c0_i32_0 : i32, i32
  }
  func.func @transform_1(%arg0: i32) -> (i32, i32) {
    %c0_i32 = arith.constant 0 : i32
    %c0_i32_0 = arith.constant 0 : i32
    return %arg0, %c0_i32 : i32, i32
  }
  func.func @transform_2(%arg0: i32) -> (i32, i32) {
    %c0_i32 = arith.constant 0 : i32
    %c0_i32_0 = arith.constant 0 : i32
    return %arg0, %c0_i32 : i32, i32
  }
}

</mosaic_0001>

<bundles_post_ra>
// kernel: tpu_custom_call.1
= control target key start
LH: loop header
LB: loop body
LE: loop exit
PB: predicated region body
PF: predicated region fallthrough
CT: control target
= control target key end

     0   :  { %7 = vsyncpa [#allocation3], 0  ;;  %s473_s0 = inlined_call_operand.hbm [shape: bf16[256,256], index: 0, kind: input, shape index: {}]   ;;  %s474_s1 = inlined_call_operand.hbm [shape: f32[8,256], index: 1, kind: input, shape index: {}]   ;;  %s475_s2 = inlined_call_operand.hbm [shape: f32[8,256], index: 2, kind: output, shape index: {}]  }
   0x1   :  { %8 = vsyncpa [#allocation6], 0 }
   0x2   :  { %9 = vsyncpa [#allocation4], 0  ;;  %s444_s9 = smov [#allocation2]  }
   0x3   :  { %s15_s10 = sshll.u32 %s444_s9, 4  ;;  %s16_s10 = int_to_ptr.vmem [resolvable:$true] %s15_s10 }
   0x4   :  { %s386_s11 = scalar_lea.vmem %s16_s10, 4096  ;;  %p391_p1 = scmp.lt.s32.totalorder %s16_s10, %s16_s10 }
   0x5   :  { %p387_p0 = scmp.ne.s32.totalorder %s16_s10, %s386_s11  ;;  %p392_p2 = scmp.lt.s32.totalorder %s386_s11, %s386_s11 }
   0x7   :  { %p393_p3 = por %p392_p2, %p391_p1 }
   0x9   :  { %p394_p4 = pnand %p393_p3, %p387_p0 }
   0xb   :  { %397 = shalt.err (!%p394_p4)
}
   0xc   :  { %s445_s12 = smov 128   ;;  %s446_s13 = smov 8  }
   0xd   :  { %21 = dma.hbm_to_vmem [thread:$0]  %s473_s0, 4096, %s16_s10, [#allocation3], %s445_s12, %s445_s12, %s446_s13  }
   0xe   :  { %s447_s16 = smov [#allocation5]  }
   0xf   :  { %s28_s17 = sshll.u32 %s447_s16, 4  ;;  %s29_s17 = int_to_ptr.vmem [resolvable:$true] %s28_s17 }
  0x10   :  { %s406_s18 = scalar_lea.vmem %s29_s17, 256  ;;  %p411_p6 = scmp.lt.s32.totalorder %s29_s17, %s29_s17 }
  0x11   :  { %p407_p5 = scmp.ne.s32.totalorder %s29_s17, %s406_s18  ;;  %p412_p7 = scmp.lt.s32.totalorder %s406_s18, %s406_s18 }
  0x13   :  { %p413_p8 = por %p412_p7, %p411_p6 }
  0x15   :  { %p414_p9 = pnand %p413_p8, %p407_p5 }
  0x17   :  { %417 = shalt.err (!%p414_p9)
}
  0x18   :  { %31 = dma.hbm_to_vmem [thread:$0]  %s474_s1, 256, %s29_s17, [#allocation6]  }
  0x19   :  { %438 = dma.done.wait [#allocation3], 4096  }
  0x1a   :  { %439 = vsyncadd [#allocation3], 4294963200 }
  0x1b   :  { %440 = dma.done.wait [#allocation6], 256  }
  0x1c   :  { %441 = vsyncadd [#allocation6], 4294967040  ;;  %v330_v0 = vld [vmem:[#allocation2 + $0x74] ss:$8 sps:$4 sm:$0xff]   ;;  %v332_v1 = vld [vmem:[#allocation2 + $0x70] ss:$8 sps:$4 sm:$0xff]  }
  0x1d   :  { %234 = vmatprep.subr.bf16.mxu0 %v330_v0  ;;  %v333_v2 = vld [vmem:[#allocation2 + $0x64] ss:$8 sps:$4 sm:$0xff]   ;;  %v335_v3 = vld [vmem:[#allocation2 + $0x60] ss:$8 sps:$4 sm:$0xff]   ;;  %v336_v4 = vld [vmem:[#allocation2 + $0x54] ss:$8 sps:$4 sm:$0xff]  }
  0x1e   :  { %235 = vmatpush1.bf16.msra.mxu0 %v332_v1  ;;  %v338_v5 = vld [vmem:[#allocation2 + $0x50] ss:$8 sps:$4 sm:$0xff]   ;;  %v339_v6 = vld [vmem:[#allocation2 + $0x44] ss:$8 sps:$4 sm:$0xff]   ;;  %v341_v7 = vld [vmem:[#allocation2 + $0x40] ss:$8 sps:$4 sm:$0xff]  }
  0x1f   :  { %236 = vmatprep.subr.bf16.mxu0 %v333_v2  ;;  %v342_v8 = vld [vmem:[#allocation2 + $0x34] ss:$8 sps:$4 sm:$0xff]   ;;  %v344_v9 = vld [vmem:[#allocation2 + $0x30] ss:$8 sps:$4 sm:$0xff]   ;;  %v345_v10 = vld [vmem:[#allocation2 + $0x24] ss:$8 sps:$4 sm:$0xff]  }
  0x20   :  { %v347_v11 = vld [vmem:[#allocation2 + $0x20] ss:$8 sps:$4 sm:$0xff]   ;;  %v348_v12 = vld [vmem:[#allocation2 + $0x14] ss:$8 sps:$4 sm:$0xff]   ;;  %v350_v15 = vld [vmem:[#allocation2 + $0x10] ss:$8 sps:$4 sm:$0xff]  }
  0x21   :  { %v39_v13 = vld [vmem:[#allocation5 + $0x8] sm:$0xff]  ;;  %v354_v18 = vld [vmem:[#allocation2 + $0xf4] ss:$8 sps:$4 sm:$0xff]   ;;  %v356_v19 = vld [vmem:[#allocation2 + $0xf0] ss:$8 sps:$4 sm:$0xff]   ;;  %s448_s0 = smov [#allocation7]  }
  0x22   :  { %237 = vmatpush1.bf16.msra.mxu0 %v335_v3  ;;  %v41_v14 = vpack.c.bf16 %v39_v13, %v39_v13  ;;  %v351_v16 = vld [vmem:[#allocation2 + $0x4] ss:$8 sps:$4 sm:$0xff]   ;;  %v353_v17 = vld [vmem:[#allocation2] ss:$8 sps:$4 sm:$0xff]   ;;  %v360_v22 = vld [vmem:[#allocation2 + $0xd4] ss:$8 sps:$4 sm:$0xff]  }
  0x23   :  { %238 = vmatprep.subr.bf16.mxu0 %v336_v4  ;;  %v357_v20 = vld [vmem:[#allocation2 + $0xe4] ss:$8 sps:$4 sm:$0xff]   ;;  %v359_v21 = vld [vmem:[#allocation2 + $0xe0] ss:$8 sps:$4 sm:$0xff]   ;;  %v362_v23 = vld [vmem:[#allocation2 + $0xd0] ss:$8 sps:$4 sm:$0xff]  }
  0x24   :  { %266 = vmatprep.mubr.bf16.mxu0 %v41_v14  ;;  %v363_v24 = vld [vmem:[#allocation2 + $0xc4] ss:$8 sps:$4 sm:$0xff]   ;;  %v365_v25 = vld [vmem:[#allocation2 + $0xc0] ss:$8 sps:$4 sm:$0xff]   ;;  %v366_v26 = vld [vmem:[#allocation2 + $0xb4] ss:$8 sps:$4 sm:$0xff]  }
  0x25   :  { %v368_v27 = vld [vmem:[#allocation2 + $0xb0] ss:$8 sps:$4 sm:$0xff]   ;;  %v369_v28 = vld [vmem:[#allocation2 + $0xa4] ss:$8 sps:$4 sm:$0xff]   ;;  %v371_v29 = vld [vmem:[#allocation2 + $0xa0] ss:$8 sps:$4 sm:$0xff]  }
  0x26   :  { %239 = vmatpush1.bf16.msra.mxu0 %v338_v5  ;;  %v372_v30 = vld [vmem:[#allocation2 + $0x94] ss:$8 sps:$4 sm:$0xff]   ;;  %v374_v31 = vld [vmem:[#allocation2 + $0x90] ss:$8 sps:$4 sm:$0xff]   ;;  %v375_v32 = vld [vmem:[#allocation2 + $0x84] ss:$8 sps:$4 sm:$0xff]  }
  0x27   :  { %240 = vmatprep.subr.bf16.mxu0 %v339_v6  ;;  %v377_v33 = vld [vmem:[#allocation2 + $0x80] ss:$8 sps:$4 sm:$0xff]   ;;  %s283_s1 = sshll.u32 %s448_s0, 4  ;;  %s284_s1 = int_to_ptr.vmem [resolvable:$true] %s283_s1 }
  0x28   :  { %v38_v34 = vld [vmem:[#allocation5] sm:$0xff]  ;;  %s418_s21 = scalar_lea.vmem %s284_s1, 256  ;;  %p423_p11 = scmp.lt.s32.totalorder %s284_s1, %s284_s1 }
  0x29   :  { %v40_v35 = vpack.c.bf16 %v38_v34, %v38_v34  ;;  %p419_p10 = scmp.ne.s32.totalorder %s284_s1, %s418_s21  ;;  %p424_p12 = scmp.lt.s32.totalorder %s418_s21, %s418_s21 }
  0x2a   :  { %241 = vmatpush1.bf16.msra.mxu0 %v341_v7 }
  0x2b   :  { %242 = vmatprep.subr.bf16.mxu0 %v342_v8  ;;  %p425_p13 = por %p424_p12, %p423_p11 }
  0x2d   :  { %p426_p0 = pnand %p425_p13, %p419_p10 }
  0x2e   :  { %243 = vmatpush1.bf16.msra.mxu0 %v344_v9 }
  0x2f   :  { %244 = vmatprep.subr.bf16.mxu0 %v345_v10 }
  0x32   :  { %245 = vmatpush1.bf16.msra.mxu0 %v347_v11 }
  0x33   :  { %246 = vmatprep.subr.bf16.mxu0 %v348_v12 }
  0x36   :  { %247 = vmatpush1.bf16.msra.mxu0 %v350_v15 }
  0x37   :  { %248 = vmatprep.subr.bf16.mxu0 %v351_v16 }
  0x3a   :  { %249 = vmatpush1.bf16.msra.mxu0 %v353_v17 }
  0x3b   :  { %250 = vmatprep.subr.bf16.mxu0 %v354_v18 }
  0x3e   :  { %251 = vmatpush2.bf16.msra.mxu0 %v356_v19 }
  0x3f   :  { %252 = vmatprep.subr.bf16.mxu0 %v357_v20 }
  0x42   :  { %253 = vmatpush2.bf16.msra.mxu0 %v359_v21 }
  0x43   :  { %254 = vmatprep.subr.bf16.mxu0 %v360_v22 }
  0x46   :  { %255 = vmatpush2.bf16.msra.mxu0 %v362_v23 }
  0x47   :  { %256 = vmatprep.subr.bf16.mxu0 %v363_v24 }
  0x4a   :  { %257 = vmatpush2.bf16.msra.mxu0 %v365_v25 }
  0x4b   :  { %258 = vmatprep.subr.bf16.mxu0 %v366_v26 }
  0x4e   :  { %259 = vmatpush2.bf16.msra.mxu0 %v368_v27 }
  0x4f   :  { %260 = vmatprep.subr.bf16.mxu0 %v369_v28 }
  0x52   :  { %261 = vmatpush2.bf16.msra.mxu0 %v371_v29 }
  0x53   :  { %262 = vmatprep.subr.bf16.mxu0 %v372_v30 }
  0x56   :  { %263 = vmatpush2.bf16.msra.mxu0 %v374_v31 }
  0x57   :  { %264 = vmatprep.subr.bf16.mxu0 %v375_v32 }
  0x5a   :  { %265 = vmatpush2.bf16.msra.mxu0 %v377_v33 }
  0x5d   :  { %267 = vmatmul.mubr.bf16.vlgmr.msra.gmra.mxu0 %v40_v35 }
 0x11d   :  { %v268_v36 = vpop.f32.mrf.mxu0 }
 0x11e   :  { %275 = vst [vmem:[#allocation7] sm:$0xff] %v268_v36 }
 0x11f   :  { %v270_v37 = vpop.f32.mrf.mxu0 }
 0x120   :  { %276 = vst [vmem:[#allocation7 + $0x8] sm:$0xff] %v270_v37 }
 0x121   :  { %v272_v38 = vpop.f32.mrf.mxu0 }
 0x122   :  { %429 = shalt.err (!%p426_p0)
}
 0x123   :  { %286 = dma.vmem_to_hbm [thread:$0]  %s284_s1, 256, %s475_s2, [#allocation4]   ;;  %v273_v39 = vpop.f32.mrf.mxu0 }
 0x124   :  { %442 = dma.done.wait [#allocation4], 256  }
 0x125   :  { %443 = vsyncadd [#allocation4], 4294967040 }
 0x126   :  { %290 = vsyncpa [#allocation3], 1 }
 0x127   :  { %291 = vsyncpa [#allocation6], 1 }
 0x128   :  { %292 = vsyncpa [#allocation4], 1 }

</bundles_post_ra>
